<compile_context>
chip_gen: v6e
topology: v6e:2x2x1
jax: 0.10.0
libtpu: 0.0.40
codegen_flags: <defaults>
</compile_context>

<pallas_src>
import functools

import jax
import jax.numpy as jnp
from jax.experimental import pallas as pl
from jax.experimental.pallas import tpu as pltpu


# ----------------------------------------------------------------------------- kernel
def _gmlp_kernel(x_ref, w13_ref, w2_ref, o_ref, *scratch,
                 n_chunks, chunk, approx_silu, compute_dtype):
    # x_ref:   (tm, H)        activation tile in its native dtype (cast in-kernel)
    # w13_ref: (H, 2*tf)      fused [w1|gate] for this F block, chunk-interleaved
    # w2_ref:  (tf, H)        W2 rows for this F block
    # o_ref:   (tm, H)        output tile (resident across the F axis)
    # scratch: optional (tm, H) f32 accumulator (only when o_ref is not f32)
    has_acc = len(scratch) == 1
    acc_ref = scratch[0] if has_acc else o_ref
    f = pl.program_id(1)

    @pl.when(f == 0)
    def _():
        acc_ref[...] = jnp.zeros_like(acc_ref)

    x = x_ref[...].astype(compute_dtype)

    # Static Python loop over 2*chunk-wide column sub-chunks of the fused weight.
    # Chunk j's W2 matmul overlaps chunk j+1's EUP/VPU gating (LLO interleaves them).
    for j in range(n_chunks):
        col0 = j * 2 * chunk
        hg = jnp.dot(x, w13_ref[:, col0:col0 + 2 * chunk],
                     preferred_element_type=jnp.float32)          # (tm, 2*chunk) f32
        h = hg[:, :chunk]                                         # W1 projection chunk
        g = hg[:, chunk:]                                         # Gate projection chunk
        # silu(h) = h * sigmoid(h); exp + reciprocal both land on the EUP slot.
        sig = pl.reciprocal(1.0 + jnp.exp(-h), approx=approx_silu)
        u = (h * sig * g).astype(compute_dtype)                   # gated activation
        # TODO(synk): dropout1/dropout2 are identity here (eval mode); training-mode
        # dropout would use pltpu.prng_seed + pltpu.prng_random_bits.
        acc_ref[...] += jnp.dot(u, w2_ref[j * chunk:(j + 1) * chunk, :],
                                preferred_element_type=jnp.float32)

    if has_acc:
        @pl.when(f == pl.num_programs(1) - 1)
        def _():
            o_ref[...] = acc_ref[...].astype(o_ref.dtype)


# ----------------------------------------------------------------- tiling / prep utils
def _device_defaults():
    """Generation-specific tile sizes and VMEM budget."""
    kind = ""
    try:
        kind = jax.devices()[0].device_kind.lower()
    except Exception:  # pragma: no cover
        pass
    if "v7" in kind:                       # 64 MiB physical VMEM, 2 TCs share HBM
        return {"tm": 512, "tf": 256, "vmem": 48 * 1024 * 1024}
    if "v6" in kind:                       # 128 MiB VMEM, ~656 FLOP/byte bf16 ridge
        return {"tm": 1024, "tf": 512, "vmem": 100 * 1024 * 1024}
    if "v5" in kind or "v4" in kind:       # 128 MiB VMEM, low ridge (~240 on v5e)
        return {"tm": 512, "tf": 512, "vmem": 100 * 1024 * 1024}
    # Unknown generation: conservative (fits a 64 MiB physical VMEM).
    return {"tm": 512, "tf": 256, "vmem": 48 * 1024 * 1024}


def _choose_tf(f_pad, block_f):
    """Largest multiple-of-128 divisor of f_pad that is <= block_f (f_pad % 128 == 0)."""
    cap = max(128, (min(block_f, f_pad) // 128) * 128)
    for tf in range(cap, 127, -128):
        if f_pad % tf == 0:
            return tf
    return 128


def _vmem_estimate(tm, tf, hdim, x_bytes, w_bytes, o_bytes, need_acc, chunk):
    est = 2 * tm * hdim * x_bytes              # x tile, double-buffered
    est += 2 * hdim * (2 * tf) * w_bytes       # fused w1|gate, double-buffered
    est += 2 * tf * hdim * w_bytes             # w2, double-buffered
    est += 2 * tm * hdim * o_bytes             # output tile, double-buffered
    if need_acc:
        est += tm * hdim * 4                   # f32 accumulator scratch
    est += 2 * tm * 2 * chunk * 4              # hg / gated f32 intermediates
    est += 2 * 1024 * 1024                     # misc internal-scratch headroom
    return est


def prepare_gmlp_params(w1, gate, w2, *, block_f=None, compute_dtype=jnp.bfloat16):
    """One-time weight prep (outside the per-call hot path).

    w1, gate: (F, H), w2: (H, F)  [PyTorch nn.Linear (out, in) layout].
    Transposes to (in, out), casts to the MXU compute dtype, pads F to a multiple of
    128 (zero-padding is exact), and packs:
      * w13: (nf, H, 2*tf) -- per-F-block contiguous, w1/gate interleaved per chunk
      * w2 : (nf, tf, H)
    """
    F, H = w1.shape
    assert gate.shape == (F, H) and w2.shape == (H, F)

    if block_f is None:
        block_f = _device_defaults()["tf"]

    f_pad = ((F + 127) // 128) * 128
    pad = f_pad - F

    w1_t = jnp.asarray(w1, compute_dtype).T      # (H, F)
    gate_t = jnp.asarray(gate, compute_dtype).T  # (H, F)
    w2_t = jnp.asarray(w2, compute_dtype).T      # (F, H)
    if pad:
        w1_t = jnp.pad(w1_t, ((0, 0), (0, pad)))
        gate_t = jnp.pad(gate_t, ((0, 0), (0, pad)))
        w2_t = jnp.pad(w2_t, ((0, pad), (0, 0)))

    tf = _choose_tf(f_pad, block_f)
    chunk = min(256, tf)
    nf = f_pad // tf
    nc = tf // chunk

    # Interleave w1/gate at chunk granularity, contiguous per F block:
    #   w13[f] columns = [w1 c0 | gate c0 | w1 c1 | gate c1 | ...]
    w1_r = w1_t.reshape(H, nf, nc, chunk)
    g_r = gate_t.reshape(H, nf, nc, chunk)
    w13 = jnp.stack([w1_r, g_r], axis=3)                      # (H, nf, nc, 2, chunk)
    w13 = jnp.transpose(w13, (1, 0, 2, 3, 4)).reshape(nf, H, 2 * tf)
    w2_blocks = w2_t.reshape(nf, tf, H)

    return {"w13": w13, "w2": w2_blocks, "tf": tf, "chunk": chunk}


# --------------------------------------------------------------------------- forward
@functools.partial(jax.jit, static_argnames=("tf", "chunk", "tm", "vmem_limit"))
def _gmlp_forward(hidden_states, w13, w2_blocks, *, tf, chunk, tm, vmem_limit):
    B, S, H = hidden_states.shape
    M = B * S
    nf = w13.shape[0]

    x2d = hidden_states.reshape(M, H)            # no pre-cast: kernel casts in VMEM
    compute_dtype = w13.dtype
    out_dtype = hidden_states.dtype
    need_acc = out_dtype != jnp.float32          # f32 output accumulates into o_ref

    kernel = functools.partial(
        _gmlp_kernel,
        n_chunks=tf // chunk,
        chunk=chunk,
        approx_silu=(compute_dtype != jnp.float32),
        compute_dtype=compute_dtype,
    )

    scratch = [pltpu.VMEM((tm, H), jnp.float32)] if need_acc else []
    grid = (pl.cdiv(M, tm), nf)                  # reduction (F) axis last

    out2d = pl.pallas_call(
        kernel,
        out_shape=jax.ShapeDtypeStruct((M, H), out_dtype),
        grid_spec=pltpu.PrefetchScalarGridSpec(
            num_scalar_prefetch=0,
            grid=grid,
            in_specs=[
                pl.BlockSpec((tm, H), lambda i, f: (i, 0)),            # x (constant over f)
                pl.BlockSpec((None, H, 2 * tf), lambda i, f: (f, 0, 0)),  # fused w1|gate
                pl.BlockSpec((None, tf, H), lambda i, f: (f, 0, 0)),      # w2 rows
            ],
            out_specs=pl.BlockSpec((tm, H), lambda i, f: (i, 0)),      # resident across f
            scratch_shapes=scratch,
        ),
        compiler_params=pltpu.CompilerParams(
            dimension_semantics=("parallel", "arbitrary"),
            vmem_limit_bytes=vmem_limit,
        ),
    )(x2d, w13, w2_blocks)

    return out2d.reshape(B, S, H)


def simple_gmlp(hidden_states, params, *, block_m=None):
    """hidden_states: (B, S, H).  params: output of prepare_gmlp_params."""
    B, S, H = hidden_states.shape
    M = B * S
    tf, chunk = params["tf"], params["chunk"]

    d = _device_defaults()
    vmem_limit = d["vmem"]
    tm_pref = block_m if block_m is not None else d["tm"]

    x_bytes = jnp.dtype(hidden_states.dtype).itemsize
    w_bytes = jnp.dtype(params["w13"].dtype).itemsize
    o_bytes = x_bytes
    need_acc = hidden_states.dtype != jnp.float32

    if M <= tm_pref:
        tm = M                                    # whole row axis in one tile
    else:
        tm = max(128, (min(tm_pref, M) // 128) * 128)
        while tm > 128 and _vmem_estimate(tm, tf, H, x_bytes, w_bytes, o_bytes,
                                          need_acc, chunk) > vmem_limit:
            tm //= 2

    out = _gmlp_forward(hidden_states, params["w13"], params["w2"],
                        tf=tf, chunk=chunk, tm=tm, vmem_limit=vmem_limit)
    return (out, None)   # matches the PyTorch module's (hidden_states, None) return


# ------------------------------------------------------------------------------ test
def _reference(hidden_states, w1, gate, w2):
    h = hidden_states @ w1.T
    g = hidden_states @ gate.T
    u = jax.nn.silu(h) * g
    return u @ w2.T


if __name__ == "__main__":
    # Small shapes: batch=2, seq=8, hidden=32, widening_factor=4 -> ffn=128
    B, S, H = 2, 8, 32
    widening_factor = 4
    F = H * widening_factor

    key = jax.random.PRNGKey(0)
    kx, k1, kg, k2 = jax.random.split(key, 4)

    x = jax.random.normal(kx, (B, S, H), dtype=jnp.float32)
    # deterministic parameter init (PyTorch nn.Linear weight shape = (out, in))
    w1 = jax.random.normal(k1, (F, H), dtype=jnp.float32) * 0.05
    gate = jax.random.normal(kg, (F, H), dtype=jnp.float32) * 0.05
    w2 = jax.random.normal(k2, (H, F), dtype=jnp.float32) * 0.05

    y_ref = _reference(x, w1, gate, w2)

    # --- f32 compute path (tight tolerance; exact reciprocal, no acc scratch) ---
    params_f32 = prepare_gmlp_params(w1, gate, w2, compute_dtype=jnp.float32)
    y32, aux = simple_gmlp(x, params_f32)
    y32 = jax.block_until_ready(y32)
    assert aux is None
    assert y32.shape == (B, S, H)
    assert jnp.allclose(y32, y_ref, atol=1e-4, rtol=1e-4), "f32 mismatch vs reference"

    # --- bf16 MXU path (production default; looser tolerance vs f32 reference) ---
    params_bf16 = prepare_gmlp_params(w1, gate, w2, compute_dtype=jnp.bfloat16)
    y16, aux16 = simple_gmlp(x, params_bf16)
    y16 = jax.block_until_ready(y16)
    assert aux16 is None
    assert y16.shape == (B, S, H)
    assert jnp.allclose(y16.astype(jnp.float32), y_ref, atol=2e-2, rtol=2e-2), \
        "bf16 mismatch vs reference"

    print("KERNEL_OK")
</pallas_src>

<mosaic_0001>
module attributes {stable_mosaic.version = 11 : i64} {
  func.func @_gmlp_kernel(%arg0: i32, %arg1: i32, %arg2: memref<16x32xf32, #tpu.memory_space<vmem>>, %arg3: memref<1x32x256xf32, #tpu.memory_space<vmem>>, %arg4: memref<1x128x32xf32, #tpu.memory_space<vmem>>, %arg5: memref<16x32xf32, #tpu.memory_space<vmem>>) attributes {dimension_semantics = [#tpu.dimension_semantics<parallel>, #tpu.dimension_semantics<arbitrary>], iteration_bounds = array<i64: 1, 1>, scalar_prefetch = 0 : i64, scratch_operands = 0 : i64, tpu.core_type = #tpu.core_type<tc>, window_params = [{transform_indices = @transform_0, window_bounds = array<i64: 16, 32>}, {transform_indices = @transform_1, window_bounds = array<i64: 1, 32, 256>}, {transform_indices = @transform_2, window_bounds = array<i64: 1, 128, 32>}, {transform_indices = @transform_3, window_bounds = array<i64: 16, 32>}]} {
    %c0_i32 = arith.constant 0 : i32
    %0 = arith.cmpi eq, %arg1, %c0_i32 : i32
    %1 = arith.extui %0 : i1 to i32
    %c0_i32_0 = arith.constant 0 : i32
    %2 = arith.cmpi ne, %1, %c0_i32_0 : i32
    scf.if %2 {
      %cst_15 = arith.constant 0.000000e+00 : f32
      %23 = vector.broadcast %cst_15 : f32 to vector<16x32xf32>
      %c0_16 = arith.constant 0 : index
      %c0_17 = arith.constant 0 : index
      %24 = vector.load %arg5[%c0_16, %c0_17] : memref<16x32xf32, #tpu.memory_space<vmem>>, vector<16x32xf32>
      tpu.vector_store %arg5[%c0_16, %c0_17], %23 {strides = array<i32>} : memref<16x32xf32, #tpu.memory_space<vmem>>, vector<16x32xf32>,
    } else {
    }
    %c0 = arith.constant 0 : index
    %c0_1 = arith.constant 0 : index
    %3 = vector.load %arg2[%c0, %c0_1] : memref<16x32xf32, #tpu.memory_space<vmem>>, vector<16x32xf32>
    %c0_2 = arith.constant 0 : index
    %c0_3 = arith.constant 0 : index
    %c0_4 = arith.constant 0 : index
    %4 = vector.load %arg3[%c0_2, %c0_3, %c0_4] : memref<1x32x256xf32, #tpu.memory_space<vmem>>, vector<1x32x256xf32>
    %5 = vector.shape_cast %4 : vector<1x32x256xf32> to vector<32x256xf32>
    %cst = arith.constant dense<0.000000e+00> : vector<16x256xf32>
    %6 = tpu.matmul %3, %5, %cst {dimension_numbers = #tpu.dot_dimension_numbers<[1], [0], [0], [1], [0, 0, 1, 1], [], []>} : vector<16x32xf32>, vector<32x256xf32>, vector<16x256xf32> -> vector<16x256xf32>
    %7 = vector.extract_strided_slice %6 {offsets = [0, 0], sizes = [16, 128], strides = [1, 1]} : vector<16x256xf32> to vector<16x128xf32>
    %8 = vector.extract_strided_slice %6 {offsets = [0, 128], sizes = [16, 128], strides = [1, 1]} : vector<16x256xf32> to vector<16x128xf32>
    %cst_5 = arith.constant 0.000000e+00 : f32
    %9 = vector.broadcast %cst_5 : f32 to vector<16x128xf32>
    %10 = arith.subf %9, %7 : vector<16x128xf32>
    %11 = math.exp %10 : vector<16x128xf32>
    %cst_6 = arith.constant 1.000000e+00 : f32
    %12 = vector.broadcast %cst_6 : f32 to vector<16x128xf32>
    %13 = arith.addf %12, %11 : vector<16x128xf32>
    %14 = tpu.reciprocal %13 : vector<16x128xf32> -> vector<16x128xf32>
    %15 = arith.mulf %7, %14 : vector<16x128xf32>
    %16 = arith.mulf %15, %8 : vector<16x128xf32>
    %c0_7 = arith.constant 0 : index
    %c0_8 = arith.constant 0 : index
    %17 = vector.load %arg5[%c0_7, %c0_8] : memref<16x32xf32, #tpu.memory_space<vmem>>, vector<16x32xf32>
    %c0_9 = arith.constant 0 : index
    %c0_10 = arith.constant 0 : index
    %c0_11 = arith.constant 0 : index
    %18 = vector.load %arg4[%c0_9, %c0_10, %c0_11] : memref<1x128x32xf32, #tpu.memory_space<vmem>>, vector<1x128x32xf32>
    %19 = vector.shape_cast %18 : vector<1x128x32xf32> to vector<128x32xf32>
    %cst_12 = arith.constant dense<0.000000e+00> : vector<16x32xf32>
    %20 = tpu.matmul %16, %19, %cst_12 {dimension_numbers = #tpu.dot_dimension_numbers<[1], [0], [0], [1], [0, 0, 1, 1], [], []>} : vector<16x128xf32>, vector<128x32xf32>, vector<16x32xf32> -> vector<16x32xf32>
    %21 = arith.addf %17, %20 : vector<16x32xf32>
    %c0_13 = arith.constant 0 : index
    %c0_14 = arith.constant 0 : index
    %22 = vector.load %arg5[%c0_13, %c0_14] : memref<16x32xf32, #tpu.memory_space<vmem>>, vector<16x32xf32>
    tpu.vector_store %arg5[%c0_13, %c0_14], %21 {strides = array<i32>} : memref<16x32xf32, #tpu.memory_space<vmem>>, vector<16x32xf32>,
    return
  }
  func.func @transform_0(%arg0: i32, %arg1: i32) -> (i32, i32) {
    %c0_i32 = arith.constant 0 : i32
    %c0_i32_0 = arith.constant 0 : i32
    return %arg0, %c0_i32 : i32, i32
  }
  func.func @transform_1(%arg0: i32, %arg1: i32) -> (i32, i32, i32) {
    %c0_i32 = arith.constant 0 : i32
    %c0_i32_0 = arith.constant 0 : i32
    %c0_i32_1 = arith.constant 0 : i32
    return %arg1, %c0_i32, %c0_i32_0 : i32, i32, i32
  }
  func.func @transform_2(%arg0: i32, %arg1: i32) -> (i32, i32, i32) {
    %c0_i32 = arith.constant 0 : i32
    %c0_i32_0 = arith.constant 0 : i32
    %c0_i32_1 = arith.constant 0 : i32
    return %arg1, %c0_i32, %c0_i32_0 : i32, i32, i32
  }
  func.func @transform_3(%arg0: i32, %arg1: i32) -> (i32, i32) {
    %c0_i32 = arith.constant 0 : i32
    %c0_i32_0 = arith.constant 0 : i32
    return %arg0, %c0_i32 : i32, i32
  }
}

</mosaic_0001>

<bundles_post_ra>
// kernel: _gmlp_forward.1
= control target key start
LH: loop header
LB: loop body
LE: loop exit
PB: predicated region body
PF: predicated region fallthrough
CT: control target
= control target key end

     0   :  { %vm19_vm0 = vcmask 261120   ;;  %v332_v4 = vmov 0.0   ;;  %s443_s0 = inlined_call_operand.vmem [shape: f32[16,32], index: 0, kind: input, shape index: {}]   ;;  %s444_s1 = inlined_call_operand.vmem [shape: f32[1,32,256], index: 1, kind: input, shape index: {}]   ;;  %s445_s2 = inlined_call_operand.vmem [shape: f32[1,128,32], index: 2, kind: input, shape index: {}]   ;;  %s446_s3 = inlined_call_operand.hbm [shape: f32[16,32], index: 3, kind: output, shape index: {}]  }
   0x1   :  { %v31_v0 = vld [vmem:[%s444_s1 + $0x38] sm:$0xff]  ;;  %v30_v1 = vld [vmem:[%s444_s1 + $0x30] sm:$0xff]  ;;  %v29_v2 = vld [vmem:[%s444_s1 + $0x28] sm:$0xff]  ;;  %20 = vst.msk [vmem:[#allocation2] sm:$0xff] %vm19_vm0, %v332_v4  ;;  %103 = vmatprep.mubr.f32.mxu0 %v332_v4 }
   0x2   :  { %63 = vmatprep.subr.mxu0 %v31_v0  ;;  %v28_v3 = vld [vmem:[%s444_s1 + $0x20] sm:$0xff]  ;;  %21 = vst.msk [vmem:[#allocation2 + $0x8] sm:$0xff] %vm19_vm0, %v332_v4  ;;  %v27_v5 = vld [vmem:[%s444_s1 + $0x18] sm:$0xff]  ;;  %v26_v6 = vld [vmem:[%s444_s1 + $0x10] sm:$0xff] }
   0x3   :  { %64 = vmatpush1.msra.mxu0 %v30_v1 }
   0x4   :  { %65 = vmatprep.subr.mxu0 %v29_v2 }
   0x5   :  { %8 = vsyncpa [#allocation3], 0  ;;  %66 = vmatpush1.msra.mxu0 %v28_v3  ;;  %v25_v7 = vld [vmem:[%s444_s1 + $0x8] sm:$0xff]  ;;  %v24_v8 = vld [vmem:[%s444_s1] sm:$0xff] }
   0x6   :  { %67 = vmatprep.subr.mxu0 %v27_v5  ;;  %v22_v9 = vld [vmem:[%s443_s0] sm:$0xff]  ;;  %v23_v10 = vld [vmem:[%s443_s0 + $0x8] sm:$0xff]  ;;  %v147_v11 = vld [vmem:[%s445_s2 + $0x78] sm:$0xff] }
   0x7   :  { %68 = vmatpush1.msra.mxu0 %v26_v6  ;;  %263 = vmatprep.subr.mxu1 %v147_v11  ;;  %v146_v12 = vld [vmem:[%s445_s2 + $0x70] sm:$0xff]  ;;  %v145_v13 = vld [vmem:[%s445_s2 + $0x68] sm:$0xff]  ;;  %v144_v14 = vld [vmem:[%s445_s2 + $0x60] sm:$0xff] }
   0x8   :  { %69 = vmatprep.subr.mxu0 %v25_v7  ;;  %264 = vmatpush3.msra.mxu1 %v147_v11  ;;  %v143_v15 = vld [vmem:[%s445_s2 + $0x58] sm:$0xff]  ;;  %v142_v16 = vld [vmem:[%s445_s2 + $0x50] sm:$0xff]  ;;  %v141_v17 = vld [vmem:[%s445_s2 + $0x48] sm:$0xff] }
   0x9   :  { %70 = vmatpush1.msra.mxu0 %v24_v8  ;;  %265 = vmatprep.subr.mxu1 %v146_v12  ;;  %v140_v18 = vld [vmem:[%s445_s2 + $0x40] sm:$0xff]  ;;  %v139_v19 = vld [vmem:[%s445_s2 + $0x38] sm:$0xff]  ;;  %v138_v20 = vld [vmem:[%s445_s2 + $0x30] sm:$0xff] }
   0xa   :  { %243 = vmatmul.mubr.msk.f32.vlgmr.msra.gmra.mxu0 %vm19_vm0, %v22_v9  ;;  %266 = vmatpush3.msra.mxu1 %v146_v12  ;;  %v137_v21 = vld [vmem:[%s445_s2 + $0x28] sm:$0xff]  ;;  %v136_v22 = vld [vmem:[%s445_s2 + $0x20] sm:$0xff]  ;;  %v135_v23 = vld [vmem:[%s445_s2 + $0x18] sm:$0xff] }
   0xb   :  { %109 = vmatprep.mubr.f32.mxu0 %v332_v4  ;;  %267 = vmatprep.subr.mxu1 %v145_v13  ;;  %v134_v24 = vld [vmem:[%s445_s2 + $0x10] sm:$0xff]  ;;  %v133_v25 = vld [vmem:[%s445_s2 + $0x8] sm:$0xff]  ;;  %v132_v26 = vld [vmem:[%s445_s2] sm:$0xff]  ;;  %s333_s2 = smov [#allocation2]  }
   0xc   :  { %268 = vmatpush3.msra.mxu1 %v145_v13  ;;  %v131_v45 = vld [vmem:[#allocation2 + $0x8] sm:$0xff]  ;;  %s232_s7 = sshll.u32 %s333_s2, 4  ;;  %v130_v47 = vld [vmem:[#allocation2] sm:$0xff]  ;;  %s233_s7 = int_to_ptr.vmem [resolvable:$true] %s232_s7 }
   0xd   :  { %269 = vmatprep.subr.mxu1 %v144_v14  ;;  %s310_s8 = scalar_lea.vmem %s233_s7, 256  ;;  %p315_p1 = scmp.lt.s32.totalorder %s233_s7, %s233_s7 }
   0xe   :  { %244 = vmatmul.mubr.msk.f32.gmra.mxu0 %vm19_vm0, %v23_v10  ;;  %270 = vmatpush3.msra.mxu1 %v144_v14  ;;  %p311_p0 = scmp.ne.s32.totalorder %s233_s7, %s310_s8  ;;  %p316_p2 = scmp.lt.s32.totalorder %s310_s8, %s310_s8 }
   0xf   :  { %271 = vmatprep.subr.mxu1 %v143_v15 }
  0x10   :  { %272 = vmatpush3.msra.mxu1 %v143_v15  ;;  %p317_p3 = por %p316_p2, %p315_p1 }
  0x11   :  { %273 = vmatprep.subr.mxu1 %v142_v16 }
  0x12   :  { %274 = vmatpush3.msra.mxu1 %v142_v16  ;;  %p318_p4 = pnand %p317_p3, %p311_p0 }
  0x13   :  { %275 = vmatprep.subr.mxu1 %v141_v17 }
  0x14   :  { %276 = vmatpush3.msra.mxu1 %v141_v17 }
  0x15   :  { %277 = vmatprep.subr.mxu1 %v140_v18 }
  0x16   :  { %278 = vmatpush3.msra.mxu1 %v140_v18 }
  0x17   :  { %279 = vmatprep.subr.mxu1 %v139_v19 }
  0x18   :  { %280 = vmatpush3.msra.mxu1 %v139_v19 }
  0x19   :  { %281 = vmatprep.subr.mxu1 %v138_v20 }
  0x1a   :  { %282 = vmatpush3.msra.mxu1 %v138_v20 }
  0x1b   :  { %283 = vmatprep.subr.mxu1 %v137_v21 }
  0x1c   :  { %284 = vmatpush3.msra.mxu1 %v137_v21 }
  0x1d   :  { %285 = vmatprep.subr.mxu1 %v136_v22 }
  0x1e   :  { %286 = vmatpush3.msra.mxu1 %v136_v22 }
  0x1f   :  { %287 = vmatprep.subr.mxu1 %v135_v23 }
  0x20   :  { %288 = vmatpush3.msra.mxu1 %v135_v23 }
  0x21   :  { %289 = vmatprep.subr.mxu1 %v134_v24 }
  0x22   :  { %290 = vmatpush3.msra.mxu1 %v134_v24 }
  0x23   :  { %291 = vmatprep.subr.mxu1 %v133_v25 }
  0x24   :  { %292 = vmatpush3.msra.mxu1 %v133_v25 }
  0x25   :  { %293 = vmatprep.subr.mxu1 %v132_v26 }
  0x26   :  { %294 = vmatpush3.msra.mxu1 %v132_v26 }
  0xca   :  { %v105_v27 = vpop.f32.mrf.mxu0 }
  0xcb   :  { %v116_v28 = vsub.f32 0.0, %v105_v27 }
  0xcc   :  { %v107_v29 = vpop.f32.mrf.mxu0 }
  0xcd   :  { %v118_v30 = vmul.f32 1.442695, %v116_v28 }
  0xce   :  { %v111_v31 = vpop.f32.mrf.mxu0 }
  0xcf   :  { %302 = vpow2.f32 %v118_v30  ;;  %v117_v32 = vsub.f32 0.0, %v111_v31 }
  0xd0   :  { %v113_v43 = vpop.f32.mrf.mxu0 }
  0xd1   :  { %v120_v33 = vmul.f32 1.442695, %v117_v32 }
  0xd3   :  { %304 = vpow2.f32 %v120_v33 }
  0xdc   :  { %v303_v34 = vpop.eup %302 }
  0xdd   :  { %v122_v35 = vadd.f32 1.0, %v303_v34 }
  0xdf   :  { %306 = vrcp.f32 %v122_v35 }
  0xe0   :  { %v305_v36 = vpop.eup %304 }
  0xe1   :  { %v123_v37 = vadd.f32 1.0, %v305_v36 }
  0xe3   :  { %308 = vrcp.f32 %v123_v37 }
  0xec   :  { %v307_v38 = vpop.eup %306 }
  0xed   :  { %v126_v39 = vmul.f32 %v307_v38, %v105_v27 }
  0xef   :  { %v128_v40 = vmul.f32 %v126_v39, %v107_v29 }
  0xf0   :  { %v309_v41 = vpop.eup %308 }
  0xf1   :  { %v127_v42 = vmul.f32 %v309_v41, %v111_v31  ;;  %295 = vmatprep.mubr.f32.mxu1 %v128_v40 }
  0xf3   :  { %v129_v44 = vmul.f32 %v127_v42, %v113_v43 }
  0xf5   :  { %296 = vmatmul.mubr.f32.vlgmr.msra.gmra.mxu1 %v129_v44 }
 0x1b5   :  { %v297_v46 = vpop.f32.mrf.mxu1 }
 0x1b6   :  { %v224_v48 = vadd.f32 %v297_v46, %v131_v45 }
 0x1b7   :  { %v214_v49 = vpop.f32.mrf.mxu1 }
 0x1b8   :  { %226 = vst.msk [vmem:[#allocation2 + $0x8] sm:$0xff] %vm19_vm0, %v224_v48  ;;  %v223_v50 = vadd.f32 %v214_v49, %v130_v47 }
 0x1ba   :  { %225 = vst.msk [vmem:[#allocation2] sm:$0xff] %vm19_vm0, %v223_v50 }
 0x1bb   :  { %321 = shalt.err (!%p318_p4)
}
 0x1bc   :  { %s334_s9 = smov 128   ;;  %s335_s0 = smov 8  }
 0x1bd   :  { %238 = dma.vmem_to_hbm [thread:$0]  %s233_s7, 256, %s446_s3, [#allocation3], %s334_s9, %s334_s9, %s335_s0  }
 0x1be   :  { %330 = dma.done.wait [#allocation3], 256  }
 0x1bf   :  { %331 = vsyncadd [#allocation3], 4294967040 }
 0x1c0   :  { %242 = vsyncpa [#allocation3], 1 }

</bundles_post_ra>
